<compile_context>
chip_gen: v5e
topology: v5e:2x2
jax: 0.10.0
libtpu: 0.0.40
codegen_flags: <defaults>
</compile_context>

<pallas_src>
import jax
import jax.numpy as jnp
from jax.experimental import pallas as pl
from jax.experimental.pallas import tpu as pltpu

# ----------------------------- config ---------------------------------------
B = 2            # batch
S = 8            # sequence length
V = 64           # vocab size (synthetic)
H = 32           # hidden_size
C = 8            # num_classes
C_PAD = 128      # lane-dense padded class dim (sliced back to C in wrapper)
NUM_TYPES = 2    # token type vocab


# ----------------------------- kernel ---------------------------------------
def bert_classifier_kernel(
    # scalar prefetch (SMEM)
    tok_ref,     # [B, S] int32
    seg_ref,     # [B, S] int32
    vlen_ref,    # [B]    int32
    # tensor inputs
    wemb_hbm,    # [V, H]         f32   word embeddings (HBM, gathered via DMA)
    temb_hbm,    # [NUM_TYPES, H] f32   token-type embeddings (HBM, gathered)
    wpool_ref,   # [H, H]     bf16  pooler dense weight (VMEM)
    bpool_ref,   # [1, H]     f32   pooler dense bias
    wcls_ref,    # [H, C_PAD] bf16  classifier weight (lane-dense padded)
    bcls_ref,    # [1, C_PAD] f32   classifier bias   (lane-dense padded)
    # output
    out_ref,     # [1, 1, C_PAD] f32 logits block for this batch row
    # scratch
    wbuf,        # [S, H] f32 gathered word-embedding rows
    tbuf,        # [S, H] f32 gathered token-type rows
    sem,         # DMA sems (2, S)
):
    b = pl.program_id(0)

    # --- gather: DMA only the S rows this batch element needs ----------------
    copies = []
    for s in range(S):
        tok = tok_ref[b, s]
        seg = seg_ref[b, s]
        cw = pltpu.make_async_copy(
            wemb_hbm.at[pl.ds(tok, 1), :], wbuf.at[pl.ds(s, 1), :], sem.at[0, s])
        ct = pltpu.make_async_copy(
            temb_hbm.at[pl.ds(seg, 1), :], tbuf.at[pl.ds(s, 1), :], sem.at[1, s])
        cw.start()
        ct.start()
        copies.append((cw, ct))
    for cw, ct in copies:
        cw.wait()
        ct.wait()

    hidden = wbuf[...] + tbuf[...]                                   # [S, H] f32

    # --- attention mask + masked mean pool (direct reduction over S) ---------
    # mask[s] = 1 iff s < valid_length[b]   (same as generate_attention_mask)
    vlen = vlen_ref[b]
    pos = jax.lax.broadcasted_iota(jnp.int32, (S, 1), 0)
    mask = (pos < vlen).astype(jnp.float32)                          # [S, 1]
    pooled_sum = jnp.sum(hidden * mask, axis=0, keepdims=True)       # [1, H]
    count = jnp.maximum(vlen.astype(jnp.float32), 1.0)
    pooled = pooled_sum / count                                      # [1, H] f32

    # --- BERT pooler stand-in: tanh(dense(pooled)); MXU in bf16, acc f32 -----
    pooler = jnp.tanh(
        jnp.dot(pooled.astype(jnp.bfloat16), wpool_ref[...],
                preferred_element_type=jnp.float32)
        + bpool_ref[...]
    )                                                                # [1, H] f32

    # --- dropout: identity at inference (eval mode) --------------------------
    out = pooler

    # --- classifier: Linear(hidden_size, num_classes), lane-dense output -----
    logits = (jnp.dot(out.astype(jnp.bfloat16), wcls_ref[...],
                      preferred_element_type=jnp.float32)
              + bcls_ref[...])                                       # [1, C_PAD]
    out_ref[...] = logits.reshape(1, 1, C_PAD)


# ----------------------------- wrapper ---------------------------------------
def bert_classifier(token_ids, valid_length, segment_ids, params):
    grid_spec = pltpu.PrefetchScalarGridSpec(
        num_scalar_prefetch=3,
        grid=(B,),
        in_specs=[
            pl.BlockSpec(memory_space=pl.ANY),                 # word emb (HBM)
            pl.BlockSpec(memory_space=pl.ANY),                 # type emb (HBM)
            pl.BlockSpec((H, H), lambda b, *_: (0, 0)),        # pooler W
            pl.BlockSpec((1, H), lambda b, *_: (0, 0)),        # pooler b
            pl.BlockSpec((H, C_PAD), lambda b, *_: (0, 0)),    # classifier W
            pl.BlockSpec((1, C_PAD), lambda b, *_: (0, 0)),    # classifier b
        ],
        out_specs=pl.BlockSpec((1, 1, C_PAD), lambda b, *_: (b, 0, 0)),
        scratch_shapes=[
            pltpu.VMEM((S, H), jnp.float32),
            pltpu.VMEM((S, H), jnp.float32),
            pltpu.SemaphoreType.DMA((2, S)),
        ],
    )
    logits_pad = pl.pallas_call(
        bert_classifier_kernel,
        out_shape=jax.ShapeDtypeStruct((B, 1, C_PAD), jnp.float32),
        grid_spec=grid_spec,
        compiler_params=pltpu.CompilerParams(
            dimension_semantics=("parallel",)),
    )(
        token_ids.astype(jnp.int32),
        segment_ids.astype(jnp.int32),
        valid_length.reshape(-1).astype(jnp.int32),
        params["word_emb"],
        params["type_emb"],
        params["w_pool"],
        params["b_pool"],
        params["w_cls_pad"],
        params["b_cls_pad"],
    )
    # slice the lane-padded class dim back to num_classes
    return logits_pad.reshape(B, C_PAD)[:, :C]


# ----------------------------- params init -----------------------------------
def init_params(key):
    ks = jax.random.split(key, 4)
    scale = 0.02
    w_cls = scale * jax.random.normal(ks[2], (H, C), jnp.float32)
    b_cls = jnp.zeros((1, C), jnp.float32)
    w_cls_pad = jnp.zeros((H, C_PAD), jnp.bfloat16).at[:, :C].set(
        w_cls.astype(jnp.bfloat16))
    b_cls_pad = jnp.zeros((1, C_PAD), jnp.float32).at[:, :C].set(b_cls)
    return {
        "word_emb": scale * jax.random.normal(ks[0], (V, H), jnp.float32),
        "type_emb": scale * jax.random.normal(ks[1], (NUM_TYPES, H), jnp.float32),
        "w_pool": (scale * jax.random.normal(ks[3], (H, H), jnp.float32)
                   ).astype(jnp.bfloat16),
        "b_pool": jnp.zeros((1, H), jnp.float32),
        "w_cls_pad": w_cls_pad,
        "b_cls_pad": b_cls_pad,
    }


if __name__ == "__main__":
    key = jax.random.PRNGKey(0)
    k_tok, k_seg, k_len, k_par = jax.random.split(key, 4)

    token_ids = jax.random.randint(k_tok, (B, S), 0, V, dtype=jnp.int32)
    segment_ids = jax.random.randint(k_seg, (B, S), 0, NUM_TYPES, dtype=jnp.int32)
    valid_length = jax.random.randint(k_len, (B, 1), 1, S + 1, dtype=jnp.int32)

    params = init_params(k_par)

    logits = bert_classifier(token_ids, valid_length, segment_ids, params)
    jax.block_until_ready(logits)

    assert logits.shape == (B, C) and logits.dtype == jnp.float32
    print("KERNEL_OK")
</pallas_src>

<mosaic_0001>
module attributes {stable_mosaic.version = 11 : i64} {
  func.func @bert_classifier_kernel(%arg0: i32, %arg1: memref<2x8xi32, #tpu.memory_space<smem>>, %arg2: memref<2x8xi32, #tpu.memory_space<smem>>, %arg3: memref<2xi32, #tpu.memory_space<smem>>, %arg4: memref<64x32xf32, #tpu.memory_space<any>>, %arg5: memref<2x32xf32, #tpu.memory_space<any>>, %arg6: memref<32x32xbf16, #tpu.memory_space<vmem>>, %arg7: memref<1x32xf32, #tpu.memory_space<vmem>>, %arg8: memref<32x128xbf16, #tpu.memory_space<vmem>>, %arg9: memref<1x128xf32, #tpu.memory_space<vmem>>, %arg10: memref<1x1x128xf32, #tpu.memory_space<vmem>>, %arg11: memref<8x32xf32, #tpu.memory_space<vmem>>, %arg12: memref<8x32xf32, #tpu.memory_space<vmem>>, %arg13: memref<2x8x!tpu.dma_semaphore, #tpu.memory_space<semaphore_mem>>) attributes {dimension_semantics = [#tpu.dimension_semantics<parallel>], iteration_bounds = array<i64: 2>, scalar_prefetch = 3 : i64, scratch_operands = 3 : i64, tpu.core_type = #tpu.core_type<tc>, window_params = [{}, {}, {pipeline_mode = #tpu.pipeline_mode<synchronous>, transform_indices = @transform_2, window_bounds = array<i64: 32, 32>}, {pipeline_mode = #tpu.pipeline_mode<synchronous>, transform_indices = @transform_3, window_bounds = array<i64: 1, 32>}, {pipeline_mode = #tpu.pipeline_mode<synchronous>, transform_indices = @transform_4, window_bounds = array<i64: 32, 128>}, {pipeline_mode = #tpu.pipeline_mode<synchronous>, transform_indices = @transform_5, window_bounds = array<i64: 1, 128>}, {transform_indices = @transform_6, window_bounds = array<i64: 1, 1, 128>}]} {
    %0 = arith.index_cast %arg0 : i32 to index
    %c0 = arith.constant 0 : index
    %1 = memref.load %arg1[%0, %c0] : memref<2x8xi32, #tpu.memory_space<smem>>
    %2 = arith.index_cast %arg0 : i32 to index
    %c0_0 = arith.constant 0 : index
    %3 = memref.load %arg2[%2, %c0_0] : memref<2x8xi32, #tpu.memory_space<smem>>
    %c0_i32 = arith.constant 0 : i32
    %c0_i32_1 = arith.constant 0 : i32
    %c0_i32_2 = arith.constant 0 : i32
    %4 = tpu.memref_slice %arg4[%1, %c0_i32_2] : memref<64x32xf32, #tpu.memory_space<any>> -> memref<1x32xf32, #tpu.memory_space<any>>
    %c0_i32_3 = arith.constant 0 : i32
    %c0_i32_4 = arith.constant 0 : i32
    %5 = tpu.memref_slice %arg11[%c0_i32_3, %c0_i32_4] : memref<8x32xf32, #tpu.memory_space<vmem>> -> memref<1x32xf32, #tpu.memory_space<vmem>>
    %6 = tpu.memref_slice %arg13[%c0_i32, %c0_i32_1] : memref<2x8x!tpu.dma_semaphore, #tpu.memory_space<semaphore_mem>> -> memref<1x1x!tpu.dma_semaphore, #tpu.memory_space<semaphore_mem>>
    %7 = tpu.memref_squeeze %6 : memref<1x1x!tpu.dma_semaphore, #tpu.memory_space<semaphore_mem>> -> memref<!tpu.dma_semaphore, #tpu.memory_space<semaphore_mem>>
    tpu.enqueue_dma source(%4 : memref<1x32xf32, #tpu.memory_space<any>>) target(%5 : memref<1x32xf32, #tpu.memory_space<vmem>>) target_semaphore(%7 : memref<!tpu.dma_semaphore, #tpu.memory_space<semaphore_mem>>)
    %c1_i32 = arith.constant 1 : i32
    %c0_i32_5 = arith.constant 0 : i32
    %c0_i32_6 = arith.constant 0 : i32
    %8 = tpu.memref_slice %arg5[%3, %c0_i32_6] : memref<2x32xf32, #tpu.memory_space<any>> -> memref<1x32xf32, #tpu.memory_space<any>>
    %c0_i32_7 = arith.constant 0 : i32
    %c0_i32_8 = arith.constant 0 : i32
    %9 = tpu.memref_slice %arg12[%c0_i32_7, %c0_i32_8] : memref<8x32xf32, #tpu.memory_space<vmem>> -> memref<1x32xf32, #tpu.memory_space<vmem>>
    %10 = tpu.memref_slice %arg13[%c1_i32, %c0_i32_5] : memref<2x8x!tpu.dma_semaphore, #tpu.memory_space<semaphore_mem>> -> memref<1x1x!tpu.dma_semaphore, #tpu.memory_space<semaphore_mem>>
    %11 = tpu.memref_squeeze %10 : memref<1x1x!tpu.dma_semaphore, #tpu.memory_space<semaphore_mem>> -> memref<!tpu.dma_semaphore, #tpu.memory_space<semaphore_mem>>
    tpu.enqueue_dma source(%8 : memref<1x32xf32, #tpu.memory_space<any>>) target(%9 : memref<1x32xf32, #tpu.memory_space<vmem>>) target_semaphore(%11 : memref<!tpu.dma_semaphore, #tpu.memory_space<semaphore_mem>>)
    %12 = arith.index_cast %arg0 : i32 to index
    %c1 = arith.constant 1 : index
    %13 = memref.load %arg1[%12, %c1] : memref<2x8xi32, #tpu.memory_space<smem>>
    %14 = arith.index_cast %arg0 : i32 to index
    %c1_9 = arith.constant 1 : index
    %15 = memref.load %arg2[%14, %c1_9] : memref<2x8xi32, #tpu.memory_space<smem>>
    %c0_i32_10 = arith.constant 0 : i32
    %c1_i32_11 = arith.constant 1 : i32
    %c0_i32_12 = arith.constant 0 : i32
    %16 = tpu.memref_slice %arg4[%13, %c0_i32_12] : memref<64x32xf32, #tpu.memory_space<any>> -> memref<1x32xf32, #tpu.memory_space<any>>
    %c1_i32_13 = arith.constant 1 : i32
    %c0_i32_14 = arith.constant 0 : i32
    %17 = tpu.memref_slice %arg11[%c1_i32_13, %c0_i32_14] : memref<8x32xf32, #tpu.memory_space<vmem>> -> memref<1x32xf32, #tpu.memory_space<vmem>>
    %18 = tpu.memref_slice %arg13[%c0_i32_10, %c1_i32_11] : memref<2x8x!tpu.dma_semaphore, #tpu.memory_space<semaphore_mem>> -> memref<1x1x!tpu.dma_semaphore, #tpu.memory_space<semaphore_mem>>
    %19 = tpu.memref_squeeze %18 : memref<1x1x!tpu.dma_semaphore, #tpu.memory_space<semaphore_mem>> -> memref<!tpu.dma_semaphore, #tpu.memory_space<semaphore_mem>>
    tpu.enqueue_dma source(%16 : memref<1x32xf32, #tpu.memory_space<any>>) target(%17 : memref<1x32xf32, #tpu.memory_space<vmem>>) target_semaphore(%19 : memref<!tpu.dma_semaphore, #tpu.memory_space<semaphore_mem>>)
    %c1_i32_15 = arith.constant 1 : i32
    %c1_i32_16 = arith.constant 1 : i32
    %c0_i32_17 = arith.constant 0 : i32
    %20 = tpu.memref_slice %arg5[%15, %c0_i32_17] : memref<2x32xf32, #tpu.memory_space<any>> -> memref<1x32xf32, #tpu.memory_space<any>>
    %c1_i32_18 = arith.constant 1 : i32
    %c0_i32_19 = arith.constant 0 : i32
    %21 = tpu.memref_slice %arg12[%c1_i32_18, %c0_i32_19] : memref<8x32xf32, #tpu.memory_space<vmem>> -> memref<1x32xf32, #tpu.memory_space<vmem>>
    %22 = tpu.memref_slice %arg13[%c1_i32_15, %c1_i32_16] : memref<2x8x!tpu.dma_semaphore, #tpu.memory_space<semaphore_mem>> -> memref<1x1x!tpu.dma_semaphore, #tpu.memory_space<semaphore_mem>>
    %23 = tpu.memref_squeeze %22 : memref<1x1x!tpu.dma_semaphore, #tpu.memory_space<semaphore_mem>> -> memref<!tpu.dma_semaphore, #tpu.memory_space<semaphore_mem>>
    tpu.enqueue_dma source(%20 : memref<1x32xf32, #tpu.memory_space<any>>) target(%21 : memref<1x32xf32, #tpu.memory_space<vmem>>) target_semaphore(%23 : memref<!tpu.dma_semaphore, #tpu.memory_space<semaphore_mem>>)
    %24 = arith.index_cast %arg0 : i32 to index
    %c2 = arith.constant 2 : index
    %25 = memref.load %arg1[%24, %c2] : memref<2x8xi32, #tpu.memory_space<smem>>
    %26 = arith.index_cast %arg0 : i32 to index
    %c2_20 = arith.constant 2 : index
    %27 = memref.load %arg2[%26, %c2_20] : memref<2x8xi32, #tpu.memory_space<smem>>
    %c0_i32_21 = arith.constant 0 : i32
    %c2_i32 = arith.constant 2 : i32
    %c0_i32_22 = arith.constant 0 : i32
    %28 = tpu.memref_slice %arg4[%25, %c0_i32_22] : memref<64x32xf32, #tpu.memory_space<any>> -> memref<1x32xf32, #tpu.memory_space<any>>
    %c2_i32_23 = arith.constant 2 : i32
    %c0_i32_24 = arith.constant 0 : i32
    %29 = tpu.memref_slice %arg11[%c2_i32_23, %c0_i32_24] : memref<8x32xf32, #tpu.memory_space<vmem>> -> memref<1x32xf32, #tpu.memory_space<vmem>>
    %30 = tpu.memref_slice %arg13[%c0_i32_21, %c2_i32] : memref<2x8x!tpu.dma_semaphore, #tpu.memory_space<semaphore_mem>> -> memref<1x1x!tpu.dma_semaphore, #tpu.memory_space<semaphore_mem>>
    %31 = tpu.memref_squeeze %30 : memref<1x1x!tpu.dma_semaphore, #tpu.memory_space<semaphore_mem>> -> memref<!tpu.dma_semaphore, #tpu.memory_space<semaphore_mem>>
    tpu.enqueue_dma source(%28 : memref<1x32xf32, #tpu.memory_space<any>>) target(%29 : memref<1x32xf32, #tpu.memory_space<vmem>>) target_semaphore(%31 : memref<!tpu.dma_semaphore, #tpu.memory_space<semaphore_mem>>)
    %c1_i32_25 = arith.constant 1 : i32
    %c2_i32_26 = arith.constant 2 : i32
    %c0_i32_27 = arith.constant 0 : i32
    %32 = tpu.memref_slice %arg5[%27, %c0_i32_27] : memref<2x32xf32, #tpu.memory_space<any>> -> memref<1x32xf32, #tpu.memory_space<any>>
    %c2_i32_28 = arith.constant 2 : i32
    %c0_i32_29 = arith.constant 0 : i32
    %33 = tpu.memref_slice %arg12[%c2_i32_28, %c0_i32_29] : memref<8x32xf32, #tpu.memory_space<vmem>> -> memref<1x32xf32, #tpu.memory_space<vmem>>
    %34 = tpu.memref_slice %arg13[%c1_i32_25, %c2_i32_26] : memref<2x8x!tpu.dma_semaphore, #tpu.memory_space<semaphore_mem>> -> memref<1x1x!tpu.dma_semaphore, #tpu.memory_space<semaphore_mem>>
    %35 = tpu.memref_squeeze %34 : memref<1x1x!tpu.dma_semaphore, #tpu.memory_space<semaphore_mem>> -> memref<!tpu.dma_semaphore, #tpu.memory_space<semaphore_mem>>
    tpu.enqueue_dma source(%32 : memref<1x32xf32, #tpu.memory_space<any>>) target(%33 : memref<1x32xf32, #tpu.memory_space<vmem>>) target_semaphore(%35 : memref<!tpu.dma_semaphore, #tpu.memory_space<semaphore_mem>>)
    %36 = arith.index_cast %arg0 : i32 to index
    %c3 = arith.constant 3 : index
    %37 = memref.load %arg1[%36, %c3] : memref<2x8xi32, #tpu.memory_space<smem>>
    %38 = arith.index_cast %arg0 : i32 to index
    %c3_30 = arith.constant 3 : index
    %39 = memref.load %arg2[%38, %c3_30] : memref<2x8xi32, #tpu.memory_space<smem>>
    %c0_i32_31 = arith.constant 0 : i32
    %c3_i32 = arith.constant 3 : i32
    %c0_i32_32 = arith.constant 0 : i32
    %40 = tpu.memref_slice %arg4[%37, %c0_i32_32] : memref<64x32xf32, #tpu.memory_space<any>> -> memref<1x32xf32, #tpu.memory_space<any>>
    %c3_i32_33 = arith.constant 3 : i32
    %c0_i32_34 = arith.constant 0 : i32
    %41 = tpu.memref_slice %arg11[%c3_i32_33, %c0_i32_34] : memref<8x32xf32, #tpu.memory_space<vmem>> -> memref<1x32xf32, #tpu.memory_space<vmem>>
    %42 = tpu.memref_slice %arg13[%c0_i32_31, %c3_i32] : memref<2x8x!tpu.dma_semaphore, #tpu.memory_space<semaphore_mem>> -> memref<1x1x!tpu.dma_semaphore, #tpu.memory_space<semaphore_mem>>
    %43 = tpu.memref_squeeze %42 : memref<1x1x!tpu.dma_semaphore, #tpu.memory_space<semaphore_mem>> -> memref<!tpu.dma_semaphore, #tpu.memory_space<semaphore_mem>>
    tpu.enqueue_dma source(%40 : memref<1x32xf32, #tpu.memory_space<any>>) target(%41 : memref<1x32xf32, #tpu.memory_space<vmem>>) target_semaphore(%43 : memref<!tpu.dma_semaphore, #tpu.memory_space<semaphore_mem>>)
    %c1_i32_35 = arith.constant 1 : i32
    %c3_i32_36 = arith.constant 3 : i32
    %c0_i32_37 = arith.constant 0 : i32
    %44 = tpu.memref_slice %arg5[%39, %c0_i32_37] : memref<2x32xf32, #tpu.memory_space<any>> -> memref<1x32xf32, #tpu.memory_space<any>>
    %c3_i32_38 = arith.constant 3 : i32
    %c0_i32_39 = arith.constant 0 : i32
    %45 = tpu.memref_slice %arg12[%c3_i32_38, %c0_i32_39] : memref<8x32xf32, #tpu.memory_space<vmem>> -> memref<1x32xf32, #tpu.memory_space<vmem>>
    %46 = tpu.memref_slice %arg13[%c1_i32_35, %c3_i32_36] : memref<2x8x!tpu.dma_semaphore, #tpu.memory_space<semaphore_mem>> -> memref<1x1x!tpu.dma_semaphore, #tpu.memory_space<semaphore_mem>>
    %47 = tpu.memref_squeeze %46 : memref<1x1x!tpu.dma_semaphore, #tpu.memory_space<semaphore_mem>> -> memref<!tpu.dma_semaphore, #tpu.memory_space<semaphore_mem>>
    tpu.enqueue_dma source(%44 : memref<1x32xf32, #tpu.memory_space<any>>) target(%45 : memref<1x32xf32, #tpu.memory_space<vmem>>) target_semaphore(%47 : memref<!tpu.dma_semaphore, #tpu.memory_space<semaphore_mem>>)
    %48 = arith.index_cast %arg0 : i32 to index
    %c4 = arith.constant 4 : index
    %49 = memref.load %arg1[%48, %c4] : memref<2x8xi32, #tpu.memory_space<smem>>
    %50 = arith.index_cast %arg0 : i32 to index
    %c4_40 = arith.constant 4 : index
    %51 = memref.load %arg2[%50, %c4_40] : memref<2x8xi32, #tpu.memory_space<smem>>
    %c0_i32_41 = arith.constant 0 : i32
    %c4_i32 = arith.constant 4 : i32
    %c0_i32_42 = arith.constant 0 : i32
    %52 = tpu.memref_slice %arg4[%49, %c0_i32_42] : memref<64x32xf32, #tpu.memory_space<any>> -> memref<1x32xf32, #tpu.memory_space<any>>
    %c4_i32_43 = arith.constant 4 : i32
    %c0_i32_44 = arith.constant 0 : i32
    %53 = tpu.memref_slice %arg11[%c4_i32_43, %c0_i32_44] : memref<8x32xf32, #tpu.memory_space<vmem>> -> memref<1x32xf32, #tpu.memory_space<vmem>>
    %54 = tpu.memref_slice %arg13[%c0_i32_41, %c4_i32] : memref<2x8x!tpu.dma_semaphore, #tpu.memory_space<semaphore_mem>> -> memref<1x1x!tpu.dma_semaphore, #tpu.memory_space<semaphore_mem>>
    %55 = tpu.memref_squeeze %54 : memref<1x1x!tpu.dma_semaphore, #tpu.memory_space<semaphore_mem>> -> memref<!tpu.dma_semaphore, #tpu.memory_space<semaphore_mem>>
    tpu.enqueue_dma source(%52 : memref<1x32xf32, #tpu.memory_space<any>>) target(%53 : memref<1x32xf32, #tpu.memory_space<vmem>>) target_semaphore(%55 : memref<!tpu.dma_semaphore, #tpu.memory_space<semaphore_mem>>)
    %c1_i32_45 = arith.constant 1 : i32
    %c4_i32_46 = arith.constant 4 : i32
    %c0_i32_47 = arith.constant 0 : i32
    %56 = tpu.memref_slice %arg5[%51, %c0_i32_47] : memref<2x32xf32, #tpu.memory_space<any>> -> memref<1x32xf32, #tpu.memory_space<any>>
    %c4_i32_48 = arith.constant 4 : i32
    %c0_i32_49 = arith.constant 0 : i32
    %57 = tpu.memref_slice %arg12[%c4_i32_48, %c0_i32_49] : memref<8x32xf32, #tpu.memory_space<vmem>> -> memref<1x32xf32, #tpu.memory_space<vmem>>
    %58 = tpu.memref_slice %arg13[%c1_i32_45, %c4_i32_46] : memref<2x8x!tpu.dma_semaphore, #tpu.memory_space<semaphore_mem>> -> memref<1x1x!tpu.dma_semaphore, #tpu.memory_space<semaphore_mem>>
    %59 = tpu.memref_squeeze %58 : memref<1x1x!tpu.dma_semaphore, #tpu.memory_space<semaphore_mem>> -> memref<!tpu.dma_semaphore, #tpu.memory_space<semaphore_mem>>
    tpu.enqueue_dma source(%56 : memref<1x32xf32, #tpu.memory_space<any>>) target(%57 : memref<1x32xf32, #tpu.memory_space<vmem>>) target_semaphore(%59 : memref<!tpu.dma_semaphore, #tpu.memory_space<semaphore_mem>>)
    %60 = arith.index_cast %arg0 : i32 to index
    %c5 = arith.constant 5 : index
    %61 = memref.load %arg1[%60, %c5] : memref<2x8xi32, #tpu.memory_space<smem>>
    %62 = arith.index_cast %arg0 : i32 to index
    %c5_50 = arith.constant 5 : index
    %63 = memref.load %arg2[%62, %c5_50] : memref<2x8xi32, #tpu.memory_space<smem>>
    %c0_i32_51 = arith.constant 0 : i32
    %c5_i32 = arith.constant 5 : i32
    %c0_i32_52 = arith.constant 0 : i32
    %64 = tpu.memref_slice %arg4[%61, %c0_i32_52] : memref<64x32xf32, #tpu.memory_space<any>> -> memref<1x32xf32, #tpu.memory_space<any>>
    %c5_i32_53 = arith.constant 5 : i32
    %c0_i32_54 = arith.constant 0 : i32
    %65 = tpu.memref_slice %arg11[%c5_i32_53, %c0_i32_54] : memref<8x32xf32, #tpu.memory_space<vmem>> -> memref<1x32xf32, #tpu.memory_space<vmem>>
    %66 = tpu.memref_slice %arg13[%c0_i32_51, %c5_i32] : memref<2x8x!tpu.dma_semaphore, #tpu.memory_space<semaphore_mem>> -> memref<1x1x!tpu.dma_semaphore, #tpu.memory_space<semaphore_mem>>
    %67 = tpu.memref_squeeze %66 : memref<1x1x!tpu.dma_semaphore, #tpu.memory_space<semaphore_mem>> -> memref<!tpu.dma_semaphore, #tpu.memory_space<semaphore_mem>>
    tpu.enqueue_dma source(%64 : memref<1x32xf32, #tpu.memory_space<any>>) target(%65 : memref<1x32xf32, #tpu.memory_space<vmem>>) target_semaphore(%67 : memref<!tpu.dma_semaphore, #tpu.memory_space<semaphore_mem>>)
    %c1_i32_55 = arith.constant 1 : i32
    %c5_i32_56 = arith.constant 5 : i32
    %c0_i32_57 = arith.constant 0 : i32
    %68 = tpu.memref_slice %arg5[%63, %c0_i32_57] : memref<2x32xf32, #tpu.memory_space<any>> -> memref<1x32xf32, #tpu.memory_space<any>>
    %c5_i32_58 = arith.constant 5 : i32
    %c0_i32_59 = arith.constant 0 : i32
    %69 = tpu.memref_slice %arg12[%c5_i32_58, %c0_i32_59] : memref<8x32xf32, #tpu.memory_space<vmem>> -> memref<1x32xf32, #tpu.memory_space<vmem>>
    %70 = tpu.memref_slice %arg13[%c1_i32_55, %c5_i32_56] : memref<2x8x!tpu.dma_semaphore, #tpu.memory_space<semaphore_mem>> -> memref<1x1x!tpu.dma_semaphore, #tpu.memory_space<semaphore_mem>>
    %71 = tpu.memref_squeeze %70 : memref<1x1x!tpu.dma_semaphore, #tpu.memory_space<semaphore_mem>> -> memref<!tpu.dma_semaphore, #tpu.memory_space<semaphore_mem>>
    tpu.enqueue_dma source(%68 : memref<1x32xf32, #tpu.memory_space<any>>) target(%69 : memref<1x32xf32, #tpu.memory_space<vmem>>) target_semaphore(%71 : memref<!tpu.dma_semaphore, #tpu.memory_space<semaphore_mem>>)
    %72 = arith.index_cast %arg0 : i32 to index
    %c6 = arith.constant 6 : index
    %73 = memref.load %arg1[%72, %c6] : memref<2x8xi32, #tpu.memory_space<smem>>
    %74 = arith.index_cast %arg0 : i32 to index
    %c6_60 = arith.constant 6 : index
    %75 = memref.load %arg2[%74, %c6_60] : memref<2x8xi32, #tpu.memory_space<smem>>
    %c0_i32_61 = arith.constant 0 : i32
    %c6_i32 = arith.constant 6 : i32
    %c0_i32_62 = arith.constant 0 : i32
    %76 = tpu.memref_slice %arg4[%73, %c0_i32_62] : memref<64x32xf32, #tpu.memory_space<any>> -> memref<1x32xf32, #tpu.memory_space<any>>
    %c6_i32_63 = arith.constant 6 : i32
    %c0_i32_64 = arith.constant 0 : i32
    %77 = tpu.memref_slice %arg11[%c6_i32_63, %c0_i32_64] : memref<8x32xf32, #tpu.memory_space<vmem>> -> memref<1x32xf32, #tpu.memory_space<vmem>>
    %78 = tpu.memref_slice %arg13[%c0_i32_61, %c6_i32] : memref<2x8x!tpu.dma_semaphore, #tpu.memory_space<semaphore_mem>> -> memref<1x1x!tpu.dma_semaphore, #tpu.memory_space<semaphore_mem>>
    %79 = tpu.memref_squeeze %78 : memref<1x1x!tpu.dma_semaphore, #tpu.memory_space<semaphore_mem>> -> memref<!tpu.dma_semaphore, #tpu.memory_space<semaphore_mem>>
    tpu.enqueue_dma source(%76 : memref<1x32xf32, #tpu.memory_space<any>>) target(%77 : memref<1x32xf32, #tpu.memory_space<vmem>>) target_semaphore(%79 : memref<!tpu.dma_semaphore, #tpu.memory_space<semaphore_mem>>)
    %c1_i32_65 = arith.constant 1 : i32
    %c6_i32_66 = arith.constant 6 : i32
    %c0_i32_67 = arith.constant 0 : i32
    %80 = tpu.memref_slice %arg5[%75, %c0_i32_67] : memref<2x32xf32, #tpu.memory_space<any>> -> memref<1x32xf32, #tpu.memory_space<any>>
    %c6_i32_68 = arith.constant 6 : i32
    %c0_i32_69 = arith.constant 0 : i32
    %81 = tpu.memref_slice %arg12[%c6_i32_68, %c0_i32_69] : memref<8x32xf32, #tpu.memory_space<vmem>> -> memref<1x32xf32, #tpu.memory_space<vmem>>
    %82 = tpu.memref_slice %arg13[%c1_i32_65, %c6_i32_66] : memref<2x8x!tpu.dma_semaphore, #tpu.memory_space<semaphore_mem>> -> memref<1x1x!tpu.dma_semaphore, #tpu.memory_space<semaphore_mem>>
    %83 = tpu.memref_squeeze %82 : memref<1x1x!tpu.dma_semaphore, #tpu.memory_space<semaphore_mem>> -> memref<!tpu.dma_semaphore, #tpu.memory_space<semaphore_mem>>
    tpu.enqueue_dma source(%80 : memref<1x32xf32, #tpu.memory_space<any>>) target(%81 : memref<1x32xf32, #tpu.memory_space<vmem>>) target_semaphore(%83 : memref<!tpu.dma_semaphore, #tpu.memory_space<semaphore_mem>>)
    %84 = arith.index_cast %arg0 : i32 to index
    %c7 = arith.constant 7 : index
    %85 = memref.load %arg1[%84, %c7] : memref<2x8xi32, #tpu.memory_space<smem>>
    %86 = arith.index_cast %arg0 : i32 to index
    %c7_70 = arith.constant 7 : index
    %87 = memref.load %arg2[%86, %c7_70] : memref<2x8xi32, #tpu.memory_space<smem>>
    %c0_i32_71 = arith.constant 0 : i32
    %c7_i32 = arith.constant 7 : i32
    %c0_i32_72 = arith.constant 0 : i32
    %88 = tpu.memref_slice %arg4[%85, %c0_i32_72] : memref<64x32xf32, #tpu.memory_space<any>> -> memref<1x32xf32, #tpu.memory_space<any>>
    %c7_i32_73 = arith.constant 7 : i32
    %c0_i32_74 = arith.constant 0 : i32
    %89 = tpu.memref_slice %arg11[%c7_i32_73, %c0_i32_74] : memref<8x32xf32, #tpu.memory_space<vmem>> -> memref<1x32xf32, #tpu.memory_space<vmem>>
    %90 = tpu.memref_slice %arg13[%c0_i32_71, %c7_i32] : memref<2x8x!tpu.dma_semaphore, #tpu.memory_space<semaphore_mem>> -> memref<1x1x!tpu.dma_semaphore, #tpu.memory_space<semaphore_mem>>
    %91 = tpu.memref_squeeze %90 : memref<1x1x!tpu.dma_semaphore, #tpu.memory_space<semaphore_mem>> -> memref<!tpu.dma_semaphore, #tpu.memory_space<semaphore_mem>>
    tpu.enqueue_dma source(%88 : memref<1x32xf32, #tpu.memory_space<any>>) target(%89 : memref<1x32xf32, #tpu.memory_space<vmem>>) target_semaphore(%91 : memref<!tpu.dma_semaphore, #tpu.memory_space<semaphore_mem>>)
    %c1_i32_75 = arith.constant 1 : i32
    %c7_i32_76 = arith.constant 7 : i32
    %c0_i32_77 = arith.constant 0 : i32
    %92 = tpu.memref_slice %arg5[%87, %c0_i32_77] : memref<2x32xf32, #tpu.memory_space<any>> -> memref<1x32xf32, #tpu.memory_space<any>>
    %c7_i32_78 = arith.constant 7 : i32
    %c0_i32_79 = arith.constant 0 : i32
    %93 = tpu.memref_slice %arg12[%c7_i32_78, %c0_i32_79] : memref<8x32xf32, #tpu.memory_space<vmem>> -> memref<1x32xf32, #tpu.memory_space<vmem>>
    %94 = tpu.memref_slice %arg13[%c1_i32_75, %c7_i32_76] : memref<2x8x!tpu.dma_semaphore, #tpu.memory_space<semaphore_mem>> -> memref<1x1x!tpu.dma_semaphore, #tpu.memory_space<semaphore_mem>>
    %95 = tpu.memref_squeeze %94 : memref<1x1x!tpu.dma_semaphore, #tpu.memory_space<semaphore_mem>> -> memref<!tpu.dma_semaphore, #tpu.memory_space<semaphore_mem>>
    tpu.enqueue_dma source(%92 : memref<1x32xf32, #tpu.memory_space<any>>) target(%93 : memref<1x32xf32, #tpu.memory_space<vmem>>) target_semaphore(%95 : memref<!tpu.dma_semaphore, #tpu.memory_space<semaphore_mem>>)
    %c0_i32_80 = arith.constant 0 : i32
    %c0_i32_81 = arith.constant 0 : i32
    %c0_i32_82 = arith.constant 0 : i32
    %96 = tpu.memref_slice %arg4[%1, %c0_i32_82] : memref<64x32xf32, #tpu.memory_space<any>> -> memref<1x32xf32, #tpu.memory_space<any>>
    %c0_i32_83 = arith.constant 0 : i32
    %c0_i32_84 = arith.constant 0 : i32
    %97 = tpu.memref_slice %arg11[%c0_i32_83, %c0_i32_84] : memref<8x32xf32, #tpu.memory_space<vmem>> -> memref<1x32xf32, #tpu.memory_space<vmem>>
    %98 = tpu.memref_slice %arg13[%c0_i32_80, %c0_i32_81] : memref<2x8x!tpu.dma_semaphore, #tpu.memory_space<semaphore_mem>> -> memref<1x1x!tpu.dma_semaphore, #tpu.memory_space<semaphore_mem>>
    %99 = tpu.memref_squeeze %98 : memref<1x1x!tpu.dma_semaphore, #tpu.memory_space<semaphore_mem>> -> memref<!tpu.dma_semaphore, #tpu.memory_space<semaphore_mem>>
    tpu.wait_dma2 semaphore(%99 : memref<!tpu.dma_semaphore, #tpu.memory_space<semaphore_mem>>) src(%96 : memref<1x32xf32, #tpu.memory_space<any>>) dst(%97 : memref<1x32xf32, #tpu.memory_space<vmem>>)
    %c1_i32_85 = arith.constant 1 : i32
    %c0_i32_86 = arith.constant 0 : i32
    %c0_i32_87 = arith.constant 0 : i32
    %100 = tpu.memref_slice %arg5[%3, %c0_i32_87] : memref<2x32xf32, #tpu.memory_space<any>> -> memref<1x32xf32, #tpu.memory_space<any>>
    %c0_i32_88 = arith.constant 0 : i32
    %c0_i32_89 = arith.constant 0 : i32
    %101 = tpu.memref_slice %arg12[%c0_i32_88, %c0_i32_89] : memref<8x32xf32, #tpu.memory_space<vmem>> -> memref<1x32xf32, #tpu.memory_space<vmem>>
    %102 = tpu.memref_slice %arg13[%c1_i32_85, %c0_i32_86] : memref<2x8x!tpu.dma_semaphore, #tpu.memory_space<semaphore_mem>> -> memref<1x1x!tpu.dma_semaphore, #tpu.memory_space<semaphore_mem>>
    %103 = tpu.memref_squeeze %102 : memref<1x1x!tpu.dma_semaphore, #tpu.memory_space<semaphore_mem>> -> memref<!tpu.dma_semaphore, #tpu.memory_space<semaphore_mem>>
    tpu.wait_dma2 semaphore(%103 : memref<!tpu.dma_semaphore, #tpu.memory_space<semaphore_mem>>) src(%100 : memref<1x32xf32, #tpu.memory_space<any>>) dst(%101 : memref<1x32xf32, #tpu.memory_space<vmem>>)
    %c0_i32_90 = arith.constant 0 : i32
    %c1_i32_91 = arith.constant 1 : i32
    %c0_i32_92 = arith.constant 0 : i32
    %104 = tpu.memref_slice %arg4[%13, %c0_i32_92] : memref<64x32xf32, #tpu.memory_space<any>> -> memref<1x32xf32, #tpu.memory_space<any>>
    %c1_i32_93 = arith.constant 1 : i32
    %c0_i32_94 = arith.constant 0 : i32
    %105 = tpu.memref_slice %arg11[%c1_i32_93, %c0_i32_94] : memref<8x32xf32, #tpu.memory_space<vmem>> -> memref<1x32xf32, #tpu.memory_space<vmem>>
    %106 = tpu.memref_slice %arg13[%c0_i32_90, %c1_i32_91] : memref<2x8x!tpu.dma_semaphore, #tpu.memory_space<semaphore_mem>> -> memref<1x1x!tpu.dma_semaphore, #tpu.memory_space<semaphore_mem>>
    %107 = tpu.memref_squeeze %106 : memref<1x1x!tpu.dma_semaphore, #tpu.memory_space<semaphore_mem>> -> memref<!tpu.dma_semaphore, #tpu.memory_space<semaphore_mem>>
    tpu.wait_dma2 semaphore(%107 : memref<!tpu.dma_semaphore, #tpu.memory_space<semaphore_mem>>) src(%104 : memref<1x32xf32, #tpu.memory_space<any>>) dst(%105 : memref<1x32xf32, #tpu.memory_space<vmem>>)
    %c1_i32_95 = arith.constant 1 : i32
    %c1_i32_96 = arith.constant 1 : i32
    %c0_i32_97 = arith.constant 0 : i32
    %108 = tpu.memref_slice %arg5[%15, %c0_i32_97] : memref<2x32xf32, #tpu.memory_space<any>> -> memref<1x32xf32, #tpu.memory_space<any>>
    %c1_i32_98 = arith.constant 1 : i32
    %c0_i32_99 = arith.constant 0 : i32
    %109 = tpu.memref_slice %arg12[%c1_i32_98, %c0_i32_99] : memref<8x32xf32, #tpu.memory_space<vmem>> -> memref<1x32xf32, #tpu.memory_space<vmem>>
    %110 = tpu.memref_slice %arg13[%c1_i32_95, %c1_i32_96] : memref<2x8x!tpu.dma_semaphore, #tpu.memory_space<semaphore_mem>> -> memref<1x1x!tpu.dma_semaphore, #tpu.memory_space<semaphore_mem>>
    %111 = tpu.memref_squeeze %110 : memref<1x1x!tpu.dma_semaphore, #tpu.memory_space<semaphore_mem>> -> memref<!tpu.dma_semaphore, #tpu.memory_space<semaphore_mem>>
    tpu.wait_dma2 semaphore(%111 : memref<!tpu.dma_semaphore, #tpu.memory_space<semaphore_mem>>) src(%108 : memref<1x32xf32, #tpu.memory_space<any>>) dst(%109 : memref<1x32xf32, #tpu.memory_space<vmem>>)
    %c0_i32_100 = arith.constant 0 : i32
    %c2_i32_101 = arith.constant 2 : i32
    %c0_i32_102 = arith.constant 0 : i32
    %112 = tpu.memref_slice %arg4[%25, %c0_i32_102] : memref<64x32xf32, #tpu.memory_space<any>> -> memref<1x32xf32, #tpu.memory_space<any>>
    %c2_i32_103 = arith.constant 2 : i32
    %c0_i32_104 = arith.constant 0 : i32
    %113 = tpu.memref_slice %arg11[%c2_i32_103, %c0_i32_104] : memref<8x32xf32, #tpu.memory_space<vmem>> -> memref<1x32xf32, #tpu.memory_space<vmem>>
    %114 = tpu.memref_slice %arg13[%c0_i32_100, %c2_i32_101] : memref<2x8x!tpu.dma_semaphore, #tpu.memory_space<semaphore_mem>> -> memref<1x1x!tpu.dma_semaphore, #tpu.memory_space<semaphore_mem>>
    %115 = tpu.memref_squeeze %114 : memref<1x1x!tpu.dma_semaphore, #tpu.memory_space<semaphore_mem>> -> memref<!tpu.dma_semaphore, #tpu.memory_space<semaphore_mem>>
    tpu.wait_dma2 semaphore(%115 : memref<!tpu.dma_semaphore, #tpu.memory_space<semaphore_mem>>) src(%112 : memref<1x32xf32, #tpu.memory_space<any>>) dst(%113 : memref<1x32xf32, #tpu.memory_space<vmem>>)
    %c1_i32_105 = arith.constant 1 : i32
    %c2_i32_106 = arith.constant 2 : i32
    %c0_i32_107 = arith.constant 0 : i32
    %116 = tpu.memref_slice %arg5[%27, %c0_i32_107] : memref<2x32xf32, #tpu.memory_space<any>> -> memref<1x32xf32, #tpu.memory_space<any>>
    %c2_i32_108 = arith.constant 2 : i32
    %c0_i32_109 = arith.constant 0 : i32
    %117 = tpu.memref_slice %arg12[%c2_i32_108, %c0_i32_109] : memref<8x32xf32, #tpu.memory_space<vmem>> -> memref<1x32xf32, #tpu.memory_space<vmem>>
    %118 = tpu.memref_slice %arg13[%c1_i32_105, %c2_i32_106] : memref<2x8x!tpu.dma_semaphore, #tpu.memory_space<semaphore_mem>> -> memref<1x1x!tpu.dma_semaphore, #tpu.memory_space<semaphore_mem>>
    %119 = tpu.memref_squeeze %118 : memref<1x1x!tpu.dma_semaphore, #tpu.memory_space<semaphore_mem>> -> memref<!tpu.dma_semaphore, #tpu.memory_space<semaphore_mem>>
    tpu.wait_dma2 semaphore(%119 : memref<!tpu.dma_semaphore, #tpu.memory_space<semaphore_mem>>) src(%116 : memref<1x32xf32, #tpu.memory_space<any>>) dst(%117 : memref<1x32xf32, #tpu.memory_space<vmem>>)
    %c0_i32_110 = arith.constant 0 : i32
    %c3_i32_111 = arith.constant 3 : i32
    %c0_i32_112 = arith.constant 0 : i32
    %120 = tpu.memref_slice %arg4[%37, %c0_i32_112] : memref<64x32xf32, #tpu.memory_space<any>> -> memref<1x32xf32, #tpu.memory_space<any>>
    %c3_i32_113 = arith.constant 3 : i32
    %c0_i32_114 = arith.constant 0 : i32
    %121 = tpu.memref_slice %arg11[%c3_i32_113, %c0_i32_114] : memref<8x32xf32, #tpu.memory_space<vmem>> -> memref<1x32xf32, #tpu.memory_space<vmem>>
    %122 = tpu.memref_slice %arg13[%c0_i32_110, %c3_i32_111] : memref<2x8x!tpu.dma_semaphore, #tpu.memory_space<semaphore_mem>> -> memref<1x1x!tpu.dma_semaphore, #tpu.memory_space<semaphore_mem>>
    %123 = tpu.memref_squeeze %122 : memref<1x1x!tpu.dma_semaphore, #tpu.memory_space<semaphore_mem>> -> memref<!tpu.dma_semaphore, #tpu.memory_space<semaphore_mem>>
    tpu.wait_dma2 semaphore(%123 : memref<!tpu.dma_semaphore, #tpu.memory_space<semaphore_mem>>) src(%120 : memref<1x32xf32, #tpu.memory_space<any>>) dst(%121 : memref<1x32xf32, #tpu.memory_space<vmem>>)
    %c1_i32_115 = arith.constant 1 : i32
    %c3_i32_116 = arith.constant 3 : i32
    %c0_i32_117 = arith.constant 0 : i32
    %124 = tpu.memref_slice %arg5[%39, %c0_i32_117] : memref<2x32xf32, #tpu.memory_space<any>> -> memref<1x32xf32, #tpu.memory_space<any>>
    %c3_i32_118 = arith.constant 3 : i32
    %c0_i32_119 = arith.constant 0 : i32
    %125 = tpu.memref_slice %arg12[%c3_i32_118, %c0_i32_119] : memref<8x32xf32, #tpu.memory_space<vmem>> -> memref<1x32xf32, #tpu.memory_space<vmem>>
    %126 = tpu.memref_slice %arg13[%c1_i32_115, %c3_i32_116] : memref<2x8x!tpu.dma_semaphore, #tpu.memory_space<semaphore_mem>> -> memref<1x1x!tpu.dma_semaphore, #tpu.memory_space<semaphore_mem>>
    %127 = tpu.memref_squeeze %126 : memref<1x1x!tpu.dma_semaphore, #tpu.memory_space<semaphore_mem>> -> memref<!tpu.dma_semaphore, #tpu.memory_space<semaphore_mem>>
    tpu.wait_dma2 semaphore(%127 : memref<!tpu.dma_semaphore, #tpu.memory_space<semaphore_mem>>) src(%124 : memref<1x32xf32, #tpu.memory_space<any>>) dst(%125 : memref<1x32xf32, #tpu.memory_space<vmem>>)
    %c0_i32_120 = arith.constant 0 : i32
    %c4_i32_121 = arith.constant 4 : i32
    %c0_i32_122 = arith.constant 0 : i32
    %128 = tpu.memref_slice %arg4[%49, %c0_i32_122] : memref<64x32xf32, #tpu.memory_space<any>> -> memref<1x32xf32, #tpu.memory_space<any>>
    %c4_i32_123 = arith.constant 4 : i32
    %c0_i32_124 = arith.constant 0 : i32
    %129 = tpu.memref_slice %arg11[%c4_i32_123, %c0_i32_124] : memref<8x32xf32, #tpu.memory_space<vmem>> -> memref<1x32xf32, #tpu.memory_space<vmem>>
    %130 = tpu.memref_slice %arg13[%c0_i32_120, %c4_i32_121] : memref<2x8x!tpu.dma_semaphore, #tpu.memory_space<semaphore_mem>> -> memref<1x1x!tpu.dma_semaphore, #tpu.memory_space<semaphore_mem>>
    %131 = tpu.memref_squeeze %130 : memref<1x1x!tpu.dma_semaphore, #tpu.memory_space<semaphore_mem>> -> memref<!tpu.dma_semaphore, #tpu.memory_space<semaphore_mem>>
    tpu.wait_dma2 semaphore(%131 : memref<!tpu.dma_semaphore, #tpu.memory_space<semaphore_mem>>) src(%128 : memref<1x32xf32, #tpu.memory_space<any>>) dst(%129 : memref<1x32xf32, #tpu.memory_space<vmem>>)
    %c1_i32_125 = arith.constant 1 : i32
    %c4_i32_126 = arith.constant 4 : i32
    %c0_i32_127 = arith.constant 0 : i32
    %132 = tpu.memref_slice %arg5[%51, %c0_i32_127] : memref<2x32xf32, #tpu.memory_space<any>> -> memref<1x32xf32, #tpu.memory_space<any>>
    %c4_i32_128 = arith.constant 4 : i32
    %c0_i32_129 = arith.constant 0 : i32
    %133 = tpu.memref_slice %arg12[%c4_i32_128, %c0_i32_129] : memref<8x32xf32, #tpu.memory_space<vmem>> -> memref<1x32xf32, #tpu.memory_space<vmem>>
    %134 = tpu.memref_slice %arg13[%c1_i32_125, %c4_i32_126] : memref<2x8x!tpu.dma_semaphore, #tpu.memory_space<semaphore_mem>> -> memref<1x1x!tpu.dma_semaphore, #tpu.memory_space<semaphore_mem>>
    %135 = tpu.memref_squeeze %134 : memref<1x1x!tpu.dma_semaphore, #tpu.memory_space<semaphore_mem>> -> memref<!tpu.dma_semaphore, #tpu.memory_space<semaphore_mem>>
    tpu.wait_dma2 semaphore(%135 : memref<!tpu.dma_semaphore, #tpu.memory_space<semaphore_mem>>) src(%132 : memref<1x32xf32, #tpu.memory_space<any>>) dst(%133 : memref<1x32xf32, #tpu.memory_space<vmem>>)
    %c0_i32_130 = arith.constant 0 : i32
    %c5_i32_131 = arith.constant 5 : i32
    %c0_i32_132 = arith.constant 0 : i32
    %136 = tpu.memref_slice %arg4[%61, %c0_i32_132] : memref<64x32xf32, #tpu.memory_space<any>> -> memref<1x32xf32, #tpu.memory_space<any>>
    %c5_i32_133 = arith.constant 5 : i32
    %c0_i32_134 = arith.constant 0 : i32
    %137 = tpu.memref_slice %arg11[%c5_i32_133, %c0_i32_134] : memref<8x32xf32, #tpu.memory_space<vmem>> -> memref<1x32xf32, #tpu.memory_space<vmem>>
    %138 = tpu.memref_slice %arg13[%c0_i32_130, %c5_i32_131] : memref<2x8x!tpu.dma_semaphore, #tpu.memory_space<semaphore_mem>> -> memref<1x1x!tpu.dma_semaphore, #tpu.memory_space<semaphore_mem>>
    %139 = tpu.memref_squeeze %138 : memref<1x1x!tpu.dma_semaphore, #tpu.memory_space<semaphore_mem>> -> memref<!tpu.dma_semaphore, #tpu.memory_space<semaphore_mem>>
    tpu.wait_dma2 semaphore(%139 : memref<!tpu.dma_semaphore, #tpu.memory_space<semaphore_mem>>) src(%136 : memref<1x32xf32, #tpu.memory_space<any>>) dst(%137 : memref<1x32xf32, #tpu.memory_space<vmem>>)
    %c1_i32_135 = arith.constant 1 : i32
    %c5_i32_136 = arith.constant 5 : i32
    %c0_i32_137 = arith.constant 0 : i32
    %140 = tpu.memref_slice %arg5[%63, %c0_i32_137] : memref<2x32xf32, #tpu.memory_space<any>> -> memref<1x32xf32, #tpu.memory_space<any>>
    %c5_i32_138 = arith.constant 5 : i32
    %c0_i32_139 = arith.constant 0 : i32
    %141 = tpu.memref_slice %arg12[%c5_i32_138, %c0_i32_139] : memref<8x32xf32, #tpu.memory_space<vmem>> -> memref<1x32xf32, #tpu.memory_space<vmem>>
    %142 = tpu.memref_slice %arg13[%c1_i32_135, %c5_i32_136] : memref<2x8x!tpu.dma_semaphore, #tpu.memory_space<semaphore_mem>> -> memref<1x1x!tpu.dma_semaphore, #tpu.memory_space<semaphore_mem>>
    %143 = tpu.memref_squeeze %142 : memref<1x1x!tpu.dma_semaphore, #tpu.memory_space<semaphore_mem>> -> memref<!tpu.dma_semaphore, #tpu.memory_space<semaphore_mem>>
    tpu.wait_dma2 semaphore(%143 : memref<!tpu.dma_semaphore, #tpu.memory_space<semaphore_mem>>) src(%140 : memref<1x32xf32, #tpu.memory_space<any>>) dst(%141 : memref<1x32xf32, #tpu.memory_space<vmem>>)
    %c0_i32_140 = arith.constant 0 : i32
    %c6_i32_141 = arith.constant 6 : i32
    %c0_i32_142 = arith.constant 0 : i32
    %144 = tpu.memref_slice %arg4[%73, %c0_i32_142] : memref<64x32xf32, #tpu.memory_space<any>> -> memref<1x32xf32, #tpu.memory_space<any>>
    %c6_i32_143 = arith.constant 6 : i32
    %c0_i32_144 = arith.constant 0 : i32
    %145 = tpu.memref_slice %arg11[%c6_i32_143, %c0_i32_144] : memref<8x32xf32, #tpu.memory_space<vmem>> -> memref<1x32xf32, #tpu.memory_space<vmem>>
    %146 = tpu.memref_slice %arg13[%c0_i32_140, %c6_i32_141] : memref<2x8x!tpu.dma_semaphore, #tpu.memory_space<semaphore_mem>> -> memref<1x1x!tpu.dma_semaphore, #tpu.memory_space<semaphore_mem>>
    %147 = tpu.memref_squeeze %146 : memref<1x1x!tpu.dma_semaphore, #tpu.memory_space<semaphore_mem>> -> memref<!tpu.dma_semaphore, #tpu.memory_space<semaphore_mem>>
    tpu.wait_dma2 semaphore(%147 : memref<!tpu.dma_semaphore, #tpu.memory_space<semaphore_mem>>) src(%144 : memref<1x32xf32, #tpu.memory_space<any>>) dst(%145 : memref<1x32xf32, #tpu.memory_space<vmem>>)
    %c1_i32_145 = arith.constant 1 : i32
    %c6_i32_146 = arith.constant 6 : i32
    %c0_i32_147 = arith.constant 0 : i32
    %148 = tpu.memref_slice %arg5[%75, %c0_i32_147] : memref<2x32xf32, #tpu.memory_space<any>> -> memref<1x32xf32, #tpu.memory_space<any>>
    %c6_i32_148 = arith.constant 6 : i32
    %c0_i32_149 = arith.constant 0 : i32
    %149 = tpu.memref_slice %arg12[%c6_i32_148, %c0_i32_149] : memref<8x32xf32, #tpu.memory_space<vmem>> -> memref<1x32xf32, #tpu.memory_space<vmem>>
    %150 = tpu.memref_slice %arg13[%c1_i32_145, %c6_i32_146] : memref<2x8x!tpu.dma_semaphore, #tpu.memory_space<semaphore_mem>> -> memref<1x1x!tpu.dma_semaphore, #tpu.memory_space<semaphore_mem>>
    %151 = tpu.memref_squeeze %150 : memref<1x1x!tpu.dma_semaphore, #tpu.memory_space<semaphore_mem>> -> memref<!tpu.dma_semaphore, #tpu.memory_space<semaphore_mem>>
    tpu.wait_dma2 semaphore(%151 : memref<!tpu.dma_semaphore, #tpu.memory_space<semaphore_mem>>) src(%148 : memref<1x32xf32, #tpu.memory_space<any>>) dst(%149 : memref<1x32xf32, #tpu.memory_space<vmem>>)
    %c0_i32_150 = arith.constant 0 : i32
    %c7_i32_151 = arith.constant 7 : i32
    %c0_i32_152 = arith.constant 0 : i32
    %152 = tpu.memref_slice %arg4[%85, %c0_i32_152] : memref<64x32xf32, #tpu.memory_space<any>> -> memref<1x32xf32, #tpu.memory_space<any>>
    %c7_i32_153 = arith.constant 7 : i32
    %c0_i32_154 = arith.constant 0 : i32
    %153 = tpu.memref_slice %arg11[%c7_i32_153, %c0_i32_154] : memref<8x32xf32, #tpu.memory_space<vmem>> -> memref<1x32xf32, #tpu.memory_space<vmem>>
    %154 = tpu.memref_slice %arg13[%c0_i32_150, %c7_i32_151] : memref<2x8x!tpu.dma_semaphore, #tpu.memory_space<semaphore_mem>> -> memref<1x1x!tpu.dma_semaphore, #tpu.memory_space<semaphore_mem>>
    %155 = tpu.memref_squeeze %154 : memref<1x1x!tpu.dma_semaphore, #tpu.memory_space<semaphore_mem>> -> memref<!tpu.dma_semaphore, #tpu.memory_space<semaphore_mem>>
    tpu.wait_dma2 semaphore(%155 : memref<!tpu.dma_semaphore, #tpu.memory_space<semaphore_mem>>) src(%152 : memref<1x32xf32, #tpu.memory_space<any>>) dst(%153 : memref<1x32xf32, #tpu.memory_space<vmem>>)
    %c1_i32_155 = arith.constant 1 : i32
    %c7_i32_156 = arith.constant 7 : i32
    %c0_i32_157 = arith.constant 0 : i32
    %156 = tpu.memref_slice %arg5[%87, %c0_i32_157] : memref<2x32xf32, #tpu.memory_space<any>> -> memref<1x32xf32, #tpu.memory_space<any>>
    %c7_i32_158 = arith.constant 7 : i32
    %c0_i32_159 = arith.constant 0 : i32
    %157 = tpu.memref_slice %arg12[%c7_i32_158, %c0_i32_159] : memref<8x32xf32, #tpu.memory_space<vmem>> -> memref<1x32xf32, #tpu.memory_space<vmem>>
    %158 = tpu.memref_slice %arg13[%c1_i32_155, %c7_i32_156] : memref<2x8x!tpu.dma_semaphore, #tpu.memory_space<semaphore_mem>> -> memref<1x1x!tpu.dma_semaphore, #tpu.memory_space<semaphore_mem>>
    %159 = tpu.memref_squeeze %158 : memref<1x1x!tpu.dma_semaphore, #tpu.memory_space<semaphore_mem>> -> memref<!tpu.dma_semaphore, #tpu.memory_space<semaphore_mem>>
    tpu.wait_dma2 semaphore(%159 : memref<!tpu.dma_semaphore, #tpu.memory_space<semaphore_mem>>) src(%156 : memref<1x32xf32, #tpu.memory_space<any>>) dst(%157 : memref<1x32xf32, #tpu.memory_space<vmem>>)
    %c0_160 = arith.constant 0 : index
    %c0_161 = arith.constant 0 : index
    %160 = vector.load %arg11[%c0_160, %c0_161] : memref<8x32xf32, #tpu.memory_space<vmem>>, vector<8x32xf32>
    %c0_162 = arith.constant 0 : index
    %c0_163 = arith.constant 0 : index
    %161 = vector.load %arg12[%c0_162, %c0_163] : memref<8x32xf32, #tpu.memory_space<vmem>>, vector<8x32xf32>
    %162 = arith.addf %160, %161 : vector<8x32xf32>
    %163 = arith.index_cast %arg0 : i32 to index
    %164 = memref.load %arg3[%163] : memref<2xi32, #tpu.memory_space<smem>>
    %165 = tpu.iota {dimensions = array<i32: 0>} : vector<8x1xi32>
    %166 = vector.broadcast %164 : i32 to vector<8x1xi32>
    %167 = arith.cmpi slt, %165, %166 : vector<8x1xi32>
    %168 = arith.extui %167 : vector<8x1xi1> to vector<8x1xi32>
    %169 = arith.sitofp %168 : vector<8x1xi32> to vector<8x1xf32>
    %170 = vector.broadcast %169 : vector<8x1xf32> to vector<8x32xf32>
    %171 = arith.mulf %162, %170 : vector<8x32xf32>
    %cst = arith.constant dense<0.000000e+00> : vector<32xf32>
    %172 = vector.multi_reduction <add>, %171, %cst [0] : vector<8x32xf32> to vector<32xf32>
    %173 = vector.shape_cast %172 : vector<32xf32> to vector<1x32xf32>
    %174 = arith.sitofp %164 : i32 to f32
    %cst_164 = arith.constant 1.000000e+00 : f32
    %175 = arith.maximumf %174, %cst_164 : f32
    %176 = vector.broadcast %175 : f32 to vector<1x32xf32>
    %177 = arith.divf %173, %176 : vector<1x32xf32>
    %178 = arith.truncf %177 : vector<1x32xf32> to vector<1x32xbf16>
    %c0_165 = arith.constant 0 : index
    %c0_166 = arith.constant 0 : index
    %179 = vector.load %arg6[%c0_165, %c0_166] : memref<32x32xbf16, #tpu.memory_space<vmem>>, vector<32x32xbf16>
    %cst_167 = arith.constant dense<0.000000e+00> : vector<1x32xf32>
    %180 = tpu.matmul %178, %179, %cst_167 {dimension_numbers = #tpu.dot_dimension_numbers<[1], [0], [0], [1], [0, 0, 1, 1], [], []>} : vector<1x32xbf16>, vector<32x32xbf16>, vector<1x32xf32> -> vector<1x32xf32>
    %c0_168 = arith.constant 0 : index
    %c0_169 = arith.constant 0 : index
    %181 = vector.load %arg7[%c0_168, %c0_169] : memref<1x32xf32, #tpu.memory_space<vmem>>, vector<1x32xf32>
    %182 = arith.addf %180, %181 : vector<1x32xf32>
    %183 = math.tanh %182 : vector<1x32xf32>
    %184 = arith.truncf %183 : vector<1x32xf32> to vector<1x32xbf16>
    %c0_170 = arith.constant 0 : index
    %c0_171 = arith.constant 0 : index
    %185 = vector.load %arg8[%c0_170, %c0_171] : memref<32x128xbf16, #tpu.memory_space<vmem>>, vector<32x128xbf16>
    %cst_172 = arith.constant dense<0.000000e+00> : vector<1x128xf32>
    %186 = tpu.matmul %184, %185, %cst_172 {dimension_numbers = #tpu.dot_dimension_numbers<[1], [0], [0], [1], [0, 0, 1, 1], [], []>} : vector<1x32xbf16>, vector<32x128xbf16>, vector<1x128xf32> -> vector<1x128xf32>
    %c0_173 = arith.constant 0 : index
    %c0_174 = arith.constant 0 : index
    %187 = vector.load %arg9[%c0_173, %c0_174] : memref<1x128xf32, #tpu.memory_space<vmem>>, vector<1x128xf32>
    %188 = arith.addf %186, %187 : vector<1x128xf32>
    %189 = vector.shape_cast %188 : vector<1x128xf32> to vector<1x1x128xf32>
    %c0_175 = arith.constant 0 : index
    %c0_176 = arith.constant 0 : index
    %c0_177 = arith.constant 0 : index
    %190 = vector.load %arg10[%c0_175, %c0_176, %c0_177] : memref<1x1x128xf32, #tpu.memory_space<vmem>>, vector<1x1x128xf32>
    tpu.vector_store %arg10[%c0_175, %c0_176, %c0_177], %189 {strides = array<i32>} : memref<1x1x128xf32, #tpu.memory_space<vmem>>, vector<1x1x128xf32>,
    return
  }
  func.func @transform_2(%arg0: i32, %arg1: memref<2x8xi32, #tpu.memory_space<smem>>, %arg2: memref<2x8xi32, #tpu.memory_space<smem>>, %arg3: memref<2xi32, #tpu.memory_space<smem>>) -> (i32, i32) {
    %c0_i32 = arith.constant 0 : i32
    %c0_i32_0 = arith.constant 0 : i32
    %c0_i32_1 = arith.constant 0 : i32
    return %c0_i32, %c0_i32_0 : i32, i32
  }
  func.func @transform_3(%arg0: i32, %arg1: memref<2x8xi32, #tpu.memory_space<smem>>, %arg2: memref<2x8xi32, #tpu.memory_space<smem>>, %arg3: memref<2xi32, #tpu.memory_space<smem>>) -> (i32, i32) {
    %c0_i32 = arith.constant 0 : i32
    %c0_i32_0 = arith.constant 0 : i32
    %c0_i32_1 = arith.constant 0 : i32
    return %c0_i32, %c0_i32_0 : i32, i32
  }
  func.func @transform_4(%arg0: i32, %arg1: memref<2x8xi32, #tpu.memory_space<smem>>, %arg2: memref<2x8xi32, #tpu.memory_space<smem>>, %arg3: memref<2xi32, #tpu.memory_space<smem>>) -> (i32, i32) {
    %c0_i32 = arith.constant 0 : i32
    %c0_i32_0 = arith.constant 0 : i32
    %c0_i32_1 = arith.constant 0 : i32
    return %c0_i32, %c0_i32_0 : i32, i32
  }
  func.func @transform_5(%arg0: i32, %arg1: memref<2x8xi32, #tpu.memory_space<smem>>, %arg2: memref<2x8xi32, #tpu.memory_space<smem>>, %arg3: memref<2xi32, #tpu.memory_space<smem>>) -> (i32, i32) {
    %c0_i32 = arith.constant 0 : i32
    %c0_i32_0 = arith.constant 0 : i32
    %c0_i32_1 = arith.constant 0 : i32
    return %c0_i32, %c0_i32_0 : i32, i32
  }
  func.func @transform_6(%arg0: i32, %arg1: memref<2x8xi32, #tpu.memory_space<smem>>, %arg2: memref<2x8xi32, #tpu.memory_space<smem>>, %arg3: memref<2xi32, #tpu.memory_space<smem>>) -> (i32, i32, i32) {
    %c0_i32 = arith.constant 0 : i32
    %c0_i32_0 = arith.constant 0 : i32
    %c0_i32_1 = arith.constant 0 : i32
    return %arg0, %c0_i32, %c0_i32_0 : i32, i32, i32
  }
}

</mosaic_0001>

<bundles_post_ra>
// kernel: tpu_custom_call.1
= control target key start
LH: loop header
LB: loop body
LE: loop exit
PB: predicated region body
PF: predicated region fallthrough
CT: control target
= control target key end

     0   :  { %s1426_s15 = smov [#allocation6]   ;;  %s1427_s16 = smov [#allocation7]   ;;  %s1660_s0 = inlined_call_operand.vmem [shape: s32[2,8], index: 0, kind: input, shape index: {}]   ;;  %s1661_s3 = inlined_call_operand.vmem [shape: f32[64,32], index: 3, kind: input, shape index: {}]   ;;  %s1662_s4 = inlined_call_operand.vmem [shape: f32[2,32], index: 4, kind: input, shape index: {}]   ;;  %s1663_s5 = inlined_call_operand.vmem [shape: bf16[32,32], index: 5, kind: input, shape index: {}]   ;;  %s1664_s6 = inlined_call_operand.vmem [shape: f32[1,32], index: 6, kind: input, shape index: {}]   ;;  %s1665_s7 = inlined_call_operand.vmem [shape: bf16[32,128], index: 7, kind: input, shape index: {}]   ;;  %s1666_s8 = inlined_call_operand.vmem [shape: f32[1,128], index: 8, kind: input, shape index: {}]   ;;  %s1667_s9 = inlined_call_operand.hbm [shape: f32[2,1,128], index: 9, kind: output, shape index: {}]   ;;  %s1668_s1 = inlined_call_operand.vmem [shape: s32[2,8], index: 1, kind: input, shape index: {}]   ;;  %s1669_s2 = inlined_call_operand.vmem [shape: s32[2], index: 2, kind: input, shape index: {}]  }
   0x1   :  { %s15_s11 = sshll.u32 %s1660_s0, 4  ;;  %s20_s14 = sshll.u32 %s1668_s1, 4  ;;  %s16_s11 = int_to_ptr.vmem [resolvable:$true] %s15_s11  ;;  %s21_s14 = int_to_ptr.vmem [resolvable:$true] %s20_s14 }
   0x2   :  { %18 = dma.vmem_to_smem %s16_s11, 32, %s1426_s15, [#allocation5] }
   0x3   :  { %23 = dma.vmem_to_smem %s21_s14, 32, %s1427_s16, [#allocation5] }
   0x4   :  { %s25_s19 = sshll.u32 %s1669_s2, 4  ;;  %s1428_s20 = smov [#allocation8]   ;;  %s26_s19 = int_to_ptr.vmem [resolvable:$true] %s25_s19 }
   0x5   :  { %28 = dma.vmem_to_smem %s26_s19, 16, %s1428_s20, [#allocation5] }
   0x6   :  { %1372 = dma.done.wait [#allocation5], 80 }
   0x7   :  { %1373 = vsyncadd [#allocation5], 4294967216 }
   0x8   :  { %31 = sfence }
   0x9   :  { %32 = vsyncpa [#allocation10], 0 }
   0xa   :  { %34 = vsyncpa [#allocation10 + $0x1], 0  ;;  %s1490_s0 = smov 0   ;;  %s1492_s1 = smov 0  }
   0xb   :  { %s1494_s21 = smov 0   ;;  %s1496_s22 = smov 0  }
   0xc LB: > { %s1511_s2 = sadd.s32 4294967295, %s1424_s22   ;;  %s1199_s23 = sadd.s32 4294967294, %s1424_s22   ;;  %s1424_s22 = sphi %s1496_s22, %s1679_s22   ;;  %s1420_s21 = sphi %s1494_s21, %s1678_s21   ;;  %s1416_s1 = sphi %s1492_s1, %s1677_s1   ;;  %s1412_s0 = sphi %s1490_s0, %s1676_s0  }
   0xd   : > { %s1515_s24 = sadd.s32 1, %s1424_s22   ;;  %s131_s25 = sadd.s32 1, %s1420_s21 }
   0xe   : > { %s128_s26 = ssub.s32 %s1424_s22, %s1515_s24  ;;  %p141_p0 = scmp.ne.s32.totalorder %s1420_s21, %s1416_s1 }
   0xf   : > { %p129_p1 = scmp.eq.s32.totalorder %s128_s26, 0  ;;  %p142_p2 = scmp.eq.s32.totalorder %s1511_s2, 1 }
  0x10   : > { %p147_p3 = scmp.ne.s32.totalorder %s1416_s1, %s1412_s0  ;;  %p148_p4 = scmp.eq.s32.totalorder %s1199_s23, 1 }
  0x11   : > { %s1526_s27 = scalar_select %p129_p1, %s1420_s21, %s131_s25  }
  0x12   : > { %p1528_p5 = por %p142_p2, %p141_p0  ;;  %p1532_p6 = por %p148_p4, %p147_p3 }
  0x13   : > { %1671 = sst [smem:[#allocation45_spill]] %s1526_s27  ;;  %p1201_p7 = scmp.ge.s32.totalorder %s1424_s22, 1 }
  0x14   : > { %p178_p8 = scmp.lt.s32.totalorder %s1424_s22, 3 }
  0x16   : > { %p179_p9 = pnand %p1201_p7, %p178_p8 }
  0x17   : > { %s1670_s30 = sand.u32 (!%p179_p9), 1, %s1416_s1   ;;  %s1540_s10 = sshll.u32 (!%p179_p9), %s1511_s2, 7 }
  0x18   : > { %182 = sbr.rel (%p179_p9) target bundleno = 461 (0x1cd), region = 36  ;;  %s200_s11 = sld [smem:[#allocation6 + %s1540_s10]] (!%p179_p9) }
  0x19   : > { %s201_s12 = sld [smem:[#allocation7 + %s1540_s10]] (!%p179_p9)  ;;  %s1549_s16 = scalar_lea.vmem (!%p179_p9), [#allocation9], %s1670_s30 }
  0x1e   : > { %s202_s15 = scalar_lea.vmem %s1661_s3, %s200_s11 }
  0x1f   : > { %v217_v0 = vld [vmem:[%s202_s15] sm:$0x1] }
  0x20   : > { %218 = vst [vmem:[#allocation2] sm:$0x1] %v217_v0 }
  0x21   : > { %236 = vsyncadd [#allocation4], 16  ;;  %s237_s19 = scalar_lea.vmem %s1662_s4, %s201_s12 }
  0x22   : > { %v253_v1 = vld [vmem:[%s237_s19] sm:$0x1] }
  0x23   : > { %254 = vst [vmem:[#allocation3] sm:$0x1] %v253_v1 }
  0x24   : > { %272 = vsyncadd [#allocation4 + $0x8], 16  ;;  %s273_s20 = sadd.s32 1, %s1540_s10 }
  0x25   : > { %s274_s23 = sld [smem:[#allocation6 + %s273_s20]] }
  0x26   : > { %s275_s25 = sld [smem:[#allocation7 + %s273_s20]] }
  0x2b   : > { %s276_s11 = scalar_lea.vmem %s1661_s3, %s274_s23 }
  0x2c   : > { %v293_v2 = vld [vmem:[%s276_s11] sm:$0x1] }
  0x2d   : > { %294 = vst [vmem:[#allocation2 + $0x1] sm:$0x1] %v293_v2 }
  0x2e   : > { %312 = vsyncadd [#allocation4 + $0x1], 16  ;;  %s313_s30 = scalar_lea.vmem %s1662_s4, %s275_s25 }
  0x2f   : > { %v330_v3 = vld [vmem:[%s313_s30] sm:$0x1] }
  0x30   : > { %331 = vst [vmem:[#allocation3 + $0x1] sm:$0x1] %v330_v3 }
  0x31   : > { %349 = vsyncadd [#allocation4 + $0x9], 16  ;;  %s350_s12 = sadd.s32 2, %s1540_s10 }
  0x32   : > { %s351_s17 = sld [smem:[#allocation6 + %s350_s12]] }
  0x33   : > { %s352_s18 = sld [smem:[#allocation7 + %s350_s12]] }
  0x38   : > { %s353_s27 = scalar_lea.vmem %s1661_s3, %s351_s17 }
  0x39   : > { %v370_v4 = vld [vmem:[%s353_s27] sm:$0x1] }
  0x3a   : > { %371 = vst [vmem:[#allocation2 + $0x2] sm:$0x1] %v370_v4 }
  0x3b   : > { %389 = vsyncadd [#allocation4 + $0x2], 16  ;;  %s390_s13 = scalar_lea.vmem %s1662_s4, %s352_s18 }
  0x3c   : > { %v407_v5 = vld [vmem:[%s390_s13] sm:$0x1] }
  0x3d   : > { %408 = vst [vmem:[#allocation3 + $0x2] sm:$0x1] %v407_v5 }
  0x3e   : > { %426 = vsyncadd [#allocation4 + $0xa], 16  ;;  %s427_s30 = sadd.s32 3, %s1540_s10 }
  0x3f   : > { %s428_s25 = sld [smem:[#allocation6 + %s427_s30]] }
  0x40   : > { %s429_s11 = sld [smem:[#allocation7 + %s427_s30]] }
  0x45   : > { %s430_s12 = scalar_lea.vmem %s1661_s3, %s428_s25 }
  0x46   : > { %v447_v6 = vld [vmem:[%s430_s12] sm:$0x1] }
  0x47   : > { %448 = vst [vmem:[#allocation2 + $0x3] sm:$0x1] %v447_v6 }
  0x48   : > { %466 = vsyncadd [#allocation4 + $0x3], 16  ;;  %s467_s19 = scalar_lea.vmem %s1662_s4, %s429_s11 }
  0x49   : > { %v484_v7 = vld [vmem:[%s467_s19] sm:$0x1] }
  0x4a   : > { %485 = vst [vmem:[#allocation3 + $0x3] sm:$0x1] %v484_v7 }
  0x4b   : > { %503 = vsyncadd [#allocation4 + $0xb], 16  ;;  %s504_s18 = sadd.s32 4, %s1540_s10 }
  0x4c   : > { %s505_s20 = sld [smem:[#allocation6 + %s504_s18]] }
  0x4d   : > { %s506_s23 = sld [smem:[#allocation7 + %s504_s18]] }
  0x52   : > { %s507_s30 = scalar_lea.vmem %s1661_s3, %s505_s20 }
  0x53   : > { %v524_v8 = vld [vmem:[%s507_s30] sm:$0x1] }
  0x54   : > { %525 = vst [vmem:[#allocation2 + $0x4] sm:$0x1] %v524_v8 }
  0x55   : > { %543 = vsyncadd [#allocation4 + $0x4], 16  ;;  %s544_s15 = scalar_lea.vmem %s1662_s4, %s506_s23 }
  0x56   : > { %v561_v9 = vld [vmem:[%s544_s15] sm:$0x1] }
  0x57   : > { %562 = vst [vmem:[#allocation3 + $0x4] sm:$0x1] %v561_v9 }
  0x58   : > { %580 = vsyncadd [#allocation4 + $0xc], 16  ;;  %s581_s11 = sadd.s32 5, %s1540_s10 }
  0x59   : > { %s582_s12 = sld [smem:[#allocation6 + %s581_s11]] }
  0x5a   : > { %s583_s27 = sld [smem:[#allocation7 + %s581_s11]] }
  0x5f   : > { %s584_s18 = scalar_lea.vmem %s1661_s3, %s582_s12 }
  0x60   : > { %v601_v10 = vld [vmem:[%s584_s18] sm:$0x1] }
  0x61   : > { %602 = vst [vmem:[#allocation2 + $0x5] sm:$0x1] %v601_v10 }
  0x62   : > { %620 = vsyncadd [#allocation4 + $0x5], 16  ;;  %s621_s13 = scalar_lea.vmem %s1662_s4, %s583_s27 }
  0x63   : > { %v638_v11 = vld [vmem:[%s621_s13] sm:$0x1] }
  0x64   : > { %639 = vst [vmem:[#allocation3 + $0x5] sm:$0x1] %v638_v11 }
  0x65   : > { %657 = vsyncadd [#allocation4 + $0xd], 16  ;;  %s658_s23 = sadd.s32 6, %s1540_s10 }
  0x66   : > { %s659_s30 = sld [smem:[#allocation6 + %s658_s23]] }
  0x67   : > { %s660_s25 = sld [smem:[#allocation7 + %s658_s23]] }
  0x6c   : > { %s661_s11 = scalar_lea.vmem %s1661_s3, %s659_s30 }
  0x6d   : > { %v678_v12 = vld [vmem:[%s661_s11] sm:$0x1] }
  0x6e   : > { %679 = vst [vmem:[#allocation2 + $0x6] sm:$0x1] %v678_v12 }
  0x6f   : > { %697 = vsyncadd [#allocation4 + $0x6], 16  ;;  %s698_s19 = scalar_lea.vmem %s1662_s4, %s660_s25 }
  0x70   : > { %v715_v13 = vld [vmem:[%s698_s19] sm:$0x1] }
  0x71   : > { %716 = vst [vmem:[#allocation3 + $0x6] sm:$0x1] %v715_v13 }
  0x72   : > { %734 = vsyncadd [#allocation4 + $0xe], 16  ;;  %s735_s27 = sadd.s32 7, %s1540_s10 }
  0x73   : > { %s736_s18 = sld [smem:[#allocation6 + %s735_s27]] }
  0x74   : > { %s737_s20 = sld [smem:[#allocation7 + %s735_s27]] }
  0x79   : > { %s738_s23 = scalar_lea.vmem %s1661_s3, %s736_s18 }
  0x7a   : > { %v755_v14 = vld [vmem:[%s738_s23] sm:$0x1] }
  0x7b   : > { %756 = vst [vmem:[#allocation2 + $0x7] sm:$0x1] %v755_v14 }
  0x7c   : > { %774 = vsyncadd [#allocation4 + $0x7], 16  ;;  %s775_s15 = scalar_lea.vmem %s1662_s4, %s737_s20 }
  0x7d   : > { %v792_v15 = vld [vmem:[%s775_s15] sm:$0x1] }
  0x7e   : > { %793 = vst [vmem:[#allocation3 + $0x7] sm:$0x1] %v792_v15 }
  0x7f   : > { %811 = vsyncadd [#allocation4 + $0xf], 16 }
  0x80   : > { %1374 = dma.done.wait [#allocation4], 16 }
  0x81   : > { %1375 = vsyncadd [#allocation4], 4294967280 }
  0x82   : > { %1376 = dma.done.wait [#allocation4 + $0x8], 16 }
  0x83   : > { %1377 = vsyncadd [#allocation4 + $0x8], 4294967280 }
  0x84   : > { %1378 = dma.done.wait [#allocation4 + $0x1], 16 }
  0x85   : > { %1379 = vsyncadd [#allocation4 + $0x1], 4294967280 }
  0x86   : > { %1380 = dma.done.wait [#allocation4 + $0x9], 16 }
  0x87   : > { %1381 = vsyncadd [#allocation4 + $0x9], 4294967280 }
  0x88   : > { %1382 = dma.done.wait [#allocation4 + $0x2], 16 }
  0x89   : > { %1383 = vsyncadd [#allocation4 + $0x2], 4294967280 }
  0x8a   : > { %1384 = dma.done.wait [#allocation4 + $0xa], 16 }
  0x8b   : > { %1385 = vsyncadd [#allocation4 + $0xa], 4294967280 }
  0x8c   : > { %1386 = dma.done.wait [#allocation4 + $0x3], 16 }
  0x8d   : > { %1387 = vsyncadd [#allocation4 + $0x3], 4294967280 }
  0x8e   : > { %1388 = dma.done.wait [#allocation4 + $0xb], 16 }
  0x8f   : > { %1389 = vsyncadd [#allocation4 + $0xb], 4294967280 }
  0x90   : > { %1390 = dma.done.wait [#allocation4 + $0x4], 16 }
  0x91   : > { %1391 = vsyncadd [#allocation4 + $0x4], 4294967280 }
  0x92   : > { %1392 = dma.done.wait [#allocation4 + $0xc], 16 }
  0x93   : > { %1393 = vsyncadd [#allocation4 + $0xc], 4294967280 }
  0x94   : > { %1394 = dma.done.wait [#allocation4 + $0x5], 16 }
  0x95   : > { %1395 = vsyncadd [#allocation4 + $0x5], 4294967280 }
  0x96   : > { %1396 = dma.done.wait [#allocation4 + $0xd], 16 }
  0x97   : > { %1397 = vsyncadd [#allocation4 + $0xd], 4294967280 }
  0x98   : > { %1398 = dma.done.wait [#allocation4 + $0x6], 16 }
  0x99   : > { %1399 = vsyncadd [#allocation4 + $0x6], 4294967280 }
  0x9a   : > { %1400 = dma.done.wait [#allocation4 + $0xe], 16 }
  0x9b   : > { %1401 = vsyncadd [#allocation4 + $0xe], 4294967280 }
  0x9c   : > { %1402 = dma.done.wait [#allocation4 + $0x7], 16 }
  0x9d   : > { %1403 = vsyncadd [#allocation4 + $0x7], 4294967280 }
  0x9e   : > { %1404 = dma.done.wait [#allocation4 + $0xf], 16 }
  0x9f   : > { %1405 = vsyncadd [#allocation4 + $0xf], 4294967280  ;;  %v849_v16 = vlaneseq  ;;  %s848_s10 = sld [smem:[#allocation8 + %s1511_s2]]  ;;  %v1241_v18 = vld [vmem:[%s1663_s5 + $0x8] sm:$0xff]  ;;  %v845_v19 = vld [vmem:[#allocation2] sm:$0xff]  ;;  %v1429_v24 = vmov 0.0   ;;  %s961_s25 = scalar_lea.hbm %s1667_s9, %s1511_s2 }
  0xa0   : > { %v846_v21 = vld [vmem:[#allocation3] sm:$0xff]  ;;  %909 = vmatpush.bf16.msra.mxu0 %v1241_v18  ;;  %v1240_v22 = vld [vmem:[%s1663_s5] sm:$0xff]  ;;  %s1430_s27 = smov 1.0   ;;  %vm856_vm1 = vcmask 261120   ;;  %s963_s17 = sshll.u32 %s1549_s16, 4  ;;  %s964_s17 = int_to_ptr.vmem [resolvable:$true] %s963_s17 }
  0xa1   : > { %v850_v17 = vshrl.u32 %v849_v16, 7  ;;  %v847_v23 = vadd.f32 %v846_v21, %v845_v19  ;;  %v1243_v47 = vld [vmem:[%s1665_s7 + $0x8] sm:$0xff]  ;;  %v1242_v48 = vld [vmem:[%s1665_s7] sm:$0xff]  ;;  %s965_s19 = sshll.u32 %s961_s25, 4  ;;  %s1348_s23 = scalar_lea.hbm %s1667_s9, 2  ;;  %s966_s19 = int_to_ptr.hbm [resolvable:$true] %s965_s19 }
  0xa2   : > { %944 = vmatpush.bf16.msra.mxu1 %v1243_v47  ;;  %v887_v49 = vld [vmem:[%s1664_s6] sm:$0x1]  ;;  %s1342_s20 = sshra.s32 %s966_s19, 4  ;;  %s1343_s20 = int_to_ptr.hbm [resolvable:$true] %s1342_s20 }
  0xa3   : > { %v922_v55 = vld [vmem:[%s1666_s8] sm:$0x1]  ;;  %s1344_s26 = scalar_lea.hbm %s1343_s20, 1  ;;  %p1349_p13 = scmp.lt.s32.totalorder %s1343_s20, %s1667_s9 }
  0xa4   : > { %910 = vmatpush.bf16.msra.mxu0 %v1240_v22  ;;  %p1345_p10 = scmp.ne.s32.totalorder %s1343_s20, %s1344_s26  ;;  %p1350_p0 = scmp.lt.s32.totalorder %s1348_s23, %s1344_s26 }
  0xa5   : > { %v851_v20 = vstv %s848_s10  ;;  %s864_s12 = scvt.s32.f32 %s848_s10 }
  0xa6   : > { %vm852_vm0 = vcmp.lt.s32.totalorder %v850_v17, %v851_v20  ;;  %945 = vmatpush.bf16.msra.mxu1 %v1242_v48  ;;  %p1346_p11 = pnand %p1345_p10, %p1528_p5  ;;  %p1351_p1 = por %p1350_p0, %p1349_p13 }
  0xa7   : > { %v1203_v25 = vsel %vm852_vm0, 1.0, %v1429_v24  ;;  %s865_s18 = smax.f32 %s1430_s27, %s864_s12  ;;  %s1674_s27 = sand.u32 1, %s1416_s1  }
  0xa8   : > { %v866_v26 = vstv %s865_s18  ;;  %v855_v27 = vmul.f32 %v1203_v25, %v847_v23  ;;  %s953_s18 = scalar_lea.sflag [#allocation10], %s1674_s27  ;;  %p1347_p12 = pneg %p1346_p11 }
  0xa9   : > { %1288 = vrcp.f32 %v866_v26  ;;  %vm872_vm2 = vweird.f32 %v866_v26  ;;  %v878_v34 = vand.u32 2147483648, %v866_v26  ;;  %v876_v37 = vand.u32 2147483647, %v866_v26 }
  0xaa   : > { %v857_v28 = vsel %vm856_vm1, %v855_v27, 0.0  ;;  %p1352_p2 = pnand %p1351_p1, %p1347_p12 }
  0xab   : > { %v858_v29 = vrot.slane %v857_v28, 4  ;;  %v879_v40 = vor.u32 1.1754944e-38, %v878_v34  ;;  %vm877_vm5 = vcmp.eq.f32.partialorder %v876_v37, 8.507059e+37 }
  0xad   : > { %v859_v30 = vadd.f32 %v858_v29, %v857_v28 }
  0xaf   : > { %v1289_v31 = vpop.eup %1288  ;;  %v860_v32 = vrot.slane %v859_v30, 2 }
  0xb0   : > { %v868_v33 = vmul.f32 %v1289_v31, %v866_v26  ;;  %vm873_vm3 = vweird.f32 %v1289_v31 }
  0xb1   : > { %v861_v35 = vadd.f32 %v860_v32, %v859_v30  ;;  %vm874_vm4 = vmor %vm872_vm2, %vm873_vm3 }
  0xb2   : > { %v869_v36 = vsub.f32 1.0, %v868_v33 }
  0xb3   : > { %v862_v38 = vrot.slane %v861_v35, 1 }
  0xb4   : > { %v870_v39 = vmul.f32 %v1289_v31, %v869_v36 }
  0xb5   : > { %v863_v41 = vadd.f32 %v862_v38, %v861_v35 }
  0xb6   : > { %v871_v42 = vadd.f32 %v1289_v31, %v870_v39 }
  0xb8   : > { %v875_v43 = vsel %vm874_vm4, %v1289_v31, %v871_v42 }
  0xb9   : > { %v880_v44 = vsel %vm877_vm5, %v879_v40, %v875_v43 }
  0xba   : > { %v881_v45 = vmul.f32 %v880_v44, %v863_v41 }
  0xbc   : > { %v882_v46 = vpack.c.bf16 %v881_v45, %v881_v45 }
  0xbe   : > { %1212 = vmatmul.msk.bf16.vlgmr.msra.gmra.mxu0 %vm856_vm1, %v882_v46 }
 0x13b   : > { %v912_v50 = vpop.f32.mrf.mxu0 }
 0x13c   : > { %v913_v51 = vadd.f32 %v912_v50, %v887_v49 }
 0x13e   : > { %1290 = vtanh.f32 %v913_v51 }
 0x143   : > { %v914_v52 = vpop.f32.mrf.mxu0 }
 0x144   : > { %v1291_v53 = vpop.eup %1290 }
 0x145   : > { %v917_v54 = vpack.c.bf16 %v1291_v53, %v1291_v53 }
 0x147   : > { %1221 = vmatmul.msk.bf16.vlgmr.msra.gmra.mxu1 %vm856_vm1, %v917_v54 }
 0x1c4   : > { %v947_v56 = vpop.f32.mrf.mxu1 }
 0x1c5   : > { %v948_v57 = vadd.f32 %v947_v56, %v922_v55 }
 0x1c7   : > { %951 = vst [vmem:[%s1549_s16] sm:$0x1] %v948_v57 }
 0x1c8   : > { %1355 = shalt.err (!%p1352_p2)
}
 0x1c9   : > { %1244 = dma.vmem_to_hbm [thread:$0]  (%p1528_p5), %s964_s17, 16, %s966_s19, %s953_s18  }
 0x1cc   : > { %v949_v58 = vpop.f32.mrf.mxu1 }
 0x1cd PF: > { %p1250_p3 = scmp.ge.s32.totalorder %s1424_s22, 2  ;;  %s977_s16 = sand.u32 1, %s1412_s0  }
 0x1ce   : > { %s978_s15 = scalar_lea.sflag [#allocation10], %s977_s16 }
 0x1cf   : > { %p1247_p4 = pnand %p1250_p3, %p1532_p6 }
 0x1d1   : > { %p1248_p7 = pneg %p1247_p4 }
 0x1d3   : > { %1407 = dma.done.wait (%p1248_p7), %s978_s15, 16  }
 0x1d4   : > { %1409 = vsyncadd (%p1248_p7), %s978_s15, 4294967280  ;;  %s1675_s10 = sld [smem:[#allocation45_spill]]  ;;  %p37_p8 = scmp.ge.s32.totalorder %s1515_s24, 4  }
 0x1d5   : > { %s1676_s0 = smov %s1416_s1  ;;  %s1677_s1 = smov %s1420_s21 }
 0x1d6   : > { %s1679_s22 = smov %s1515_s24  ;;  %39 = sbr.rel (!%p37_p8) target bundleno = 12 (0xc), region = 672 }
 0x1da   : > { %s1678_s21 = smov %s1675_s10 }
 0x1db   :  { %983 = vsyncpa [#allocation10], 1 }
 0x1dc   :  { %985 = vsyncpa [#allocation10 + $0x1], 1 }
 0x1dd   :  { %986 = vsyncmov [#allocation4] }
 0x1e0   :  { %s987_s22 = vpop.sfrf %986 }
 0x1e1   :  { %p1224_p5 = scmp.ne.s32.totalorder %s987_s22, 0 }
 0x1e3   :  { %991 = shalt.err (%p1224_p5)  }
 0x1e4   :  { %993 = vsyncmov [#allocation4 + $0x1] }
 0x1e7   :  { %s994_s28 = vpop.sfrf %993 }
 0x1e8   :  { %p1225_p6 = scmp.ne.s32.totalorder %s994_s28, 0 }
 0x1ea   :  { %998 = shalt.err (%p1225_p6)  }
 0x1eb   :  { %1000 = vsyncmov [#allocation4 + $0x2] }
 0x1ee   :  { %s1001_s29 = vpop.sfrf %1000 }
 0x1ef   :  { %p1226_p9 = scmp.ne.s32.totalorder %s1001_s29, 0 }
 0x1f1   :  { %1005 = shalt.err (%p1226_p9)  }
 0x1f2   :  { %1007 = vsyncmov [#allocation4 + $0x3] }
 0x1f5   :  { %s1008_s25 = vpop.sfrf %1007 }
 0x1f6   :  { %p1227_p10 = scmp.ne.s32.totalorder %s1008_s25, 0 }
 0x1f8   :  { %1012 = shalt.err (%p1227_p10)  }
 0x1f9   :  { %1014 = vsyncmov [#allocation4 + $0x4] }
 0x1fc   :  { %s1015_s24 = vpop.sfrf %1014 }
 0x1fd   :  { %p1228_p11 = scmp.ne.s32.totalorder %s1015_s24, 0 }
 0x1ff   :  { %1019 = shalt.err (%p1228_p11)  }
 0x200   :  { %1021 = vsyncmov [#allocation4 + $0x5] }
 0x203   :  { %s1022_s3 = vpop.sfrf %1021 }
 0x204   :  { %p1229_p12 = scmp.ne.s32.totalorder %s1022_s3, 0 }
 0x206   :  { %1026 = shalt.err (%p1229_p12)  }
 0x207   :  { %1028 = vsyncmov [#allocation4 + $0x6] }
 0x20a   :  { %s1029_s4 = vpop.sfrf %1028 }
 0x20b   :  { %p1230_p13 = scmp.ne.s32.totalorder %s1029_s4, 0 }
 0x20d   :  { %1033 = shalt.err (%p1230_p13)  }
 0x20e   :  { %1035 = vsyncmov [#allocation4 + $0x7] }
 0x211   :  { %s1036_s5 = vpop.sfrf %1035 }
 0x212   :  { %p1231_p0 = scmp.ne.s32.totalorder %s1036_s5, 0 }
 0x214   :  { %1040 = shalt.err (%p1231_p0)  }
 0x215   :  { %1042 = vsyncmov [#allocation4 + $0x8] }
 0x218   :  { %s1043_s6 = vpop.sfrf %1042 }
 0x219   :  { %p1232_p1 = scmp.ne.s32.totalorder %s1043_s6, 0 }
 0x21b   :  { %1047 = shalt.err (%p1232_p1)  }
 0x21c   :  { %1049 = vsyncmov [#allocation4 + $0x9] }
 0x21f   :  { %s1050_s7 = vpop.sfrf %1049 }
 0x220   :  { %p1233_p2 = scmp.ne.s32.totalorder %s1050_s7, 0 }
 0x222   :  { %1054 = shalt.err (%p1233_p2)  }
 0x223   :  { %1056 = vsyncmov [#allocation4 + $0xa] }
 0x226   :  { %s1057_s8 = vpop.sfrf %1056 }
 0x227   :  { %p1234_p3 = scmp.ne.s32.totalorder %s1057_s8, 0 }
 0x229   :  { %1061 = shalt.err (%p1234_p3)  }
 0x22a   :  { %1063 = vsyncmov [#allocation4 + $0xb] }
 0x22d   :  { %s1064_s9 = vpop.sfrf %1063 }
 0x22e   :  { %p1235_p4 = scmp.ne.s32.totalorder %s1064_s9, 0 }
 0x230   :  { %1068 = shalt.err (%p1235_p4)  }
 0x231   :  { %1070 = vsyncmov [#allocation4 + $0xc] }
 0x234   :  { %s1071_s0 = vpop.sfrf %1070 }
 0x235   :  { %p1236_p7 = scmp.ne.s32.totalorder %s1071_s0, 0 }
 0x237   :  { %1075 = shalt.err (%p1236_p7)  }
 0x238   :  { %1077 = vsyncmov [#allocation4 + $0xd] }
 0x23b   :  { %s1078_s1 = vpop.sfrf %1077 }
 0x23c   :  { %p1237_p8 = scmp.ne.s32.totalorder %s1078_s1, 0 }
 0x23e   :  { %1082 = shalt.err (%p1237_p8)  }
 0x23f   :  { %1084 = vsyncmov [#allocation4 + $0xe] }
 0x242   :  { %s1085_s21 = vpop.sfrf %1084 }
 0x243   :  { %p1238_p5 = scmp.ne.s32.totalorder %s1085_s21, 0 }
 0x245   :  { %1089 = shalt.err (%p1238_p5)  }
 0x246   :  { %1091 = vsyncmov [#allocation4 + $0xf] }
 0x249   :  { %s1092_s11 = vpop.sfrf %1091 }
 0x24a   :  { %p1239_p6 = scmp.ne.s32.totalorder %s1092_s11, 0 }
 0x24c   :  { %1096 = shalt.err (%p1239_p6)  }

</bundles_post_ra>
